<compile_context>
chip_gen: v6e
topology: v6e:2x2x1
jax: 0.10.0
libtpu: 0.0.40
codegen_flags: <defaults>
</compile_context>

<pallas_src>
import functools

import jax
import jax.numpy as jnp
from jax import lax
from jax.experimental import pallas as pl
from jax.experimental.pallas import tpu as pltpu


def _smape_kernel(forecast_ref, target_ref, mask_ref, out_ref, acc_ref, *,
                  t_per_shard, n_t_blocks, tail_cols):
    s = pl.program_id(0)   # shard axis ("parallel": TensorCores on v7x)
    t = pl.program_id(1)   # reduction axis over T blocks ("arbitrary")

    @pl.when(t == 0)
    def _():
        acc_ref[...] = jnp.zeros_like(acc_ref)

    f = forecast_ref[...].astype(jnp.float32)
    y = target_ref[...].astype(jnp.float32)
    m = mask_ref[...].astype(jnp.float32)

    num = jnp.abs(f - y)
    den = jnp.abs(f) + jnp.abs(y)
    # divide_no_nan: num >= 0 and den >= 0, so the NaN (0/0) and Inf (x/0)
    # cases both occur exactly when den == 0; a single where guards them.
    # Exact division (not approx reciprocal) so tiny denominators stay finite.
    ratio = jnp.where(den == 0.0, 0.0, num / den)
    contrib = ratio * m

    if tail_cols == 0:
        # T divides evenly into tiles: no masking code at all.
        acc_ref[...] += contrib
    else:
        tb = s * t_per_shard + t   # global T-block index

        @pl.when(tb < n_t_blocks - 1)
        def _():
            acc_ref[...] += contrib

        @pl.when(tb == n_t_blocks - 1)
        def _():
            # Last block is ragged: zero the out-of-range columns (this also
            # squashes any NaN/Inf computed from the unspecified padding data).
            col = lax.broadcasted_iota(jnp.int32, contrib.shape, 1)
            acc_ref[...] += jnp.where(col < tail_cols, contrib, 0.0)

    @pl.when(t == t_per_shard - 1)
    def _():
        # One cross-lane/sublane reduce + one (1,1) store per shard.
        out_ref[...] = jnp.sum(acc_ref[...], keepdims=True)


def _floor_to_128(x):
    return max(128, (int(x) // 128) * 128)


def _default_num_shards():
    """Best-effort TensorCore count (2 on v7x, 1 on v5e/v6e). Never raises."""
    try:
        info = pltpu.get_tpu_info()
    except Exception:
        return 1
    for attr in ("num_tensorcores", "tensorcores_per_chip", "num_cores",
                 "cores_per_chip", "core_count"):
        v = getattr(info, attr, None)
        if isinstance(v, int) and v >= 1:
            return min(int(v), 2)
    ver = str(getattr(info, "chip_version", ""))
    return 2 if "7" in ver else 1


def smape_loss(insample, freq, forecast, target, mask, *,
               t_tile_cap=None, num_shards=None,
               vmem_budget_bytes=24 * 1024 * 1024):
    """Pallas sMAPE loss.  `insample` / `freq` are unused (matches PyTorch)."""
    del insample, freq
    B, T = forecast.shape
    assert target.shape == (B, T) and mask.shape == (B, T)

    # ---- pick the T tile ---------------------------------------------------
    # Block shape is (B, T_TILE): batch kept whole (equals the full array dim,
    # so the (8,128) constraint holds for any B); T_TILE is a multiple of 128.
    in_bytes = sum(jnp.dtype(a.dtype).itemsize for a in (forecast, target, mask))
    bytes_per_col = B * (2 * in_bytes + 4)   # 3 inputs x 2 buffers + f32 acc
    cols_budget = _floor_to_128(vmem_budget_bytes // bytes_per_col)
    cols_target = _floor_to_128(
        (4 * 1024 * 1024) // max(1, B * jnp.dtype(forecast.dtype).itemsize))
    cols_overlap = _floor_to_128(pl.cdiv(T, 4))   # aim for >= ~4 pipeline steps
    t_tile = min(cols_budget, cols_target, cols_overlap)
    if t_tile_cap is not None:
        t_tile = min(t_tile, _floor_to_128(t_tile_cap))
    if t_tile >= T:
        t_tile = T            # single full-width block (full dims always legal)

    n_t_blocks = pl.cdiv(T, t_tile)
    tail_cols = T % t_tile    # 0 => tail-masking code is elided at trace time

    # ---- shard across TensorCores (v7x only; 1 on v5e/v6e) ------------------
    if num_shards is None:
        num_shards = _default_num_shards()
    shards = num_shards if (num_shards > 1
                            and n_t_blocks % num_shards == 0
                            and n_t_blocks >= 2 * num_shards) else 1
    t_per_shard = n_t_blocks // shards

    kernel = functools.partial(_smape_kernel, t_per_shard=t_per_shard,
                               n_t_blocks=n_t_blocks, tail_cols=tail_cols)

    in_spec = pl.BlockSpec((B, t_tile), lambda s, t: (0, s * t_per_shard + t))

    need = bytes_per_col * t_tile + (2 << 20)
    vmem_limit = int(max(32 * 1024 * 1024, min(need, 100 * 1024 * 1024)))

    partials = pl.pallas_call(
        kernel,
        out_shape=jax.ShapeDtypeStruct((shards, 1), jnp.float32),
        grid_spec=pltpu.PrefetchScalarGridSpec(
            num_scalar_prefetch=0,
            grid=(shards, t_per_shard),
            in_specs=[in_spec, in_spec, in_spec],
            out_specs=pl.BlockSpec((1, 1), lambda s, t: (s, 0)),
            scratch_shapes=[pltpu.VMEM((B, t_tile), jnp.float32)],
        ),
        compiler_params=pltpu.CompilerParams(
            dimension_semantics=("parallel", "arbitrary"),
            vmem_limit_bytes=vmem_limit,
        ),
    )(forecast, target, mask)

    # torch.mean divides by B*T (not sum(mask)); the masked tail contributes 0.
    return jnp.sum(partials) * (200.0 / float(B * T))


def smape_loss_ref(forecast, target, mask):
    forecast = forecast.astype(jnp.float32)
    target = target.astype(jnp.float32)
    mask = mask.astype(jnp.float32)
    num = jnp.abs(forecast - target)
    den = jnp.abs(forecast) + jnp.abs(target)
    ratio = num / den
    ratio = jnp.where(jnp.isnan(ratio) | jnp.isinf(ratio), 0.0, ratio)
    return 200.0 * jnp.mean(ratio * mask)


if __name__ == "__main__":
    key = jax.random.PRNGKey(0)
    freq = 1  # unused by forward

    # --- Case 1: module-scale shapes; exercises divide_no_nan (den==0 lanes) -
    k1, k2, k3, k4 = jax.random.split(key, 4)
    B, T = 2, 256
    forecast = jax.random.normal(k1, (B, T), dtype=jnp.float32)
    target = jax.random.normal(k2, (B, T), dtype=jnp.float32)
    mask = (jax.random.uniform(k3, (B, T)) > 0.2).astype(jnp.float32)
    both_zero = jax.random.uniform(k4, (B, T)) > 0.9
    forecast = jnp.where(both_zero, 0.0, forecast)
    target = jnp.where(both_zero, 0.0, target)
    insample = jnp.zeros((B, 16), dtype=jnp.float32)   # unused by forward

    out1 = jax.block_until_ready(smape_loss(insample, freq, forecast, target, mask))
    ref1 = smape_loss_ref(forecast, target, mask)
    assert jnp.allclose(out1, ref1, rtol=1e-5, atol=1e-5), (out1, ref1)

    # --- Case 2: T not a multiple of 128 -> several T blocks + in-kernel tail -
    k5, k6, k7 = jax.random.split(jax.random.PRNGKey(1), 3)
    B2, T2 = 8, 3000
    forecast2 = jax.random.normal(k5, (B2, T2), dtype=jnp.float32)
    target2 = jax.random.normal(k6, (B2, T2), dtype=jnp.float32)
    mask2 = (jax.random.uniform(k7, (B2, T2)) > 0.5).astype(jnp.float32)
    insample2 = jnp.zeros((B2, 16), dtype=jnp.float32)

    out2 = jax.block_until_ready(
        smape_loss(insample2, freq, forecast2, target2, mask2))
    ref2 = smape_loss_ref(forecast2, target2, mask2)
    assert jnp.allclose(out2, ref2, rtol=1e-5, atol=1e-5), (out2, ref2)

    # --- Case 3: bf16 inputs + forced 2-way shard axis (covers the v7x path;
    #     on single-TC chips the shard axis is just an outer sequential loop) --
    k8, k9, k10 = jax.random.split(jax.random.PRNGKey(2), 3)
    B3, T3 = 4, 1024
    forecast3 = jax.random.normal(k8, (B3, T3), dtype=jnp.bfloat16)
    target3 = jax.random.normal(k9, (B3, T3), dtype=jnp.bfloat16)
    mask3 = (jax.random.uniform(k10, (B3, T3)) > 0.3).astype(jnp.float32)
    insample3 = jnp.zeros((B3, 16), dtype=jnp.bfloat16)

    out3 = jax.block_until_ready(
        smape_loss(insample3, freq, forecast3, target3, mask3,
                   t_tile_cap=256, num_shards=2))
    ref3 = smape_loss_ref(forecast3, target3, mask3)
    assert jnp.allclose(out3, ref3, rtol=1e-4, atol=1e-4), (out3, ref3)

    print("KERNEL_OK")
</pallas_src>

<mosaic_0001>
module attributes {stable_mosaic.version = 11 : i64} {
  func.func @_smape_kernel(%arg0: i32, %arg1: i32, %arg2: memref<2x128xf32, #tpu.memory_space<vmem>>, %arg3: memref<2x128xf32, #tpu.memory_space<vmem>>, %arg4: memref<2x128xf32, #tpu.memory_space<vmem>>, %arg5: memref<1x1xf32, #tpu.memory_space<vmem>>, %arg6: memref<2x128xf32, #tpu.memory_space<vmem>>) attributes {dimension_semantics = [#tpu.dimension_semantics<parallel>, #tpu.dimension_semantics<arbitrary>], iteration_bounds = array<i64: 1, 2>, scalar_prefetch = 0 : i64, scratch_operands = 1 : i64, tpu.core_type = #tpu.core_type<tc>, window_params = [{transform_indices = @transform_0, window_bounds = array<i64: 2, 128>}, {transform_indices = @transform_1, window_bounds = array<i64: 2, 128>}, {transform_indices = @transform_2, window_bounds = array<i64: 2, 128>}, {transform_indices = @transform_3, window_bounds = array<i64: 1, 1>}]} {
    %c0_i32 = arith.constant 0 : i32
    %0 = arith.cmpi eq, %arg1, %c0_i32 : i32
    %1 = arith.extui %0 : i1 to i32
    %c0_i32_0 = arith.constant 0 : i32
    %2 = arith.cmpi ne, %1, %c0_i32_0 : i32
    scf.if %2 {
      %cst_12 = arith.constant 0.000000e+00 : f32
      %23 = vector.broadcast %cst_12 : f32 to vector<2x128xf32>
      %c0_13 = arith.constant 0 : index
      %c0_14 = arith.constant 0 : index
      %24 = vector.load %arg6[%c0_13, %c0_14] : memref<2x128xf32, #tpu.memory_space<vmem>>, vector<2x128xf32>
      tpu.vector_store %arg6[%c0_13, %c0_14], %23 {strides = array<i32>} : memref<2x128xf32, #tpu.memory_space<vmem>>, vector<2x128xf32>,
    } else {
    }
    %c0 = arith.constant 0 : index
    %c0_1 = arith.constant 0 : index
    %3 = vector.load %arg2[%c0, %c0_1] : memref<2x128xf32, #tpu.memory_space<vmem>>, vector<2x128xf32>
    %c0_2 = arith.constant 0 : index
    %c0_3 = arith.constant 0 : index
    %4 = vector.load %arg3[%c0_2, %c0_3] : memref<2x128xf32, #tpu.memory_space<vmem>>, vector<2x128xf32>
    %c0_4 = arith.constant 0 : index
    %c0_5 = arith.constant 0 : index
    %5 = vector.load %arg4[%c0_4, %c0_5] : memref<2x128xf32, #tpu.memory_space<vmem>>, vector<2x128xf32>
    %6 = arith.subf %3, %4 : vector<2x128xf32>
    %7 = math.absf %6 : vector<2x128xf32>
    %8 = math.absf %3 : vector<2x128xf32>
    %9 = math.absf %4 : vector<2x128xf32>
    %10 = arith.addf %8, %9 : vector<2x128xf32>
    %cst = arith.constant 0.000000e+00 : f32
    %11 = vector.broadcast %cst : f32 to vector<2x128xf32>
    %12 = arith.cmpf oeq, %10, %11 : vector<2x128xf32>
    %13 = arith.divf %7, %10 : vector<2x128xf32>
    %cst_6 = arith.constant 0.000000e+00 : f32
    %14 = vector.broadcast %cst_6 : f32 to vector<2x128xf32>
    %15 = arith.select %12, %14, %13 : vector<2x128xi1>, vector<2x128xf32>
    %16 = arith.mulf %15, %5 : vector<2x128xf32>
    %c0_7 = arith.constant 0 : index
    %c0_8 = arith.constant 0 : index
    %17 = vector.load %arg6[%c0_7, %c0_8] : memref<2x128xf32, #tpu.memory_space<vmem>>, vector<2x128xf32>
    %18 = arith.addf %17, %16 : vector<2x128xf32>
    %c0_9 = arith.constant 0 : index
    %c0_10 = arith.constant 0 : index
    %19 = vector.load %arg6[%c0_9, %c0_10] : memref<2x128xf32, #tpu.memory_space<vmem>>, vector<2x128xf32>
    tpu.vector_store %arg6[%c0_9, %c0_10], %18 {strides = array<i32>} : memref<2x128xf32, #tpu.memory_space<vmem>>, vector<2x128xf32>,
    %c1_i32 = arith.constant 1 : i32
    %20 = arith.cmpi eq, %arg1, %c1_i32 : i32
    %21 = arith.extui %20 : i1 to i32
    %c0_i32_11 = arith.constant 0 : i32
    %22 = arith.cmpi ne, %21, %c0_i32_11 : i32
    scf.if %22 {
      %c0_12 = arith.constant 0 : index
      %c0_13 = arith.constant 0 : index
      %23 = vector.load %arg6[%c0_12, %c0_13] : memref<2x128xf32, #tpu.memory_space<vmem>>, vector<2x128xf32>
      %24 = vector.shape_cast %23 : vector<2x128xf32> to vector<1x2x128xf32>
      %cst_14 = arith.constant dense<0.000000e+00> : vector<1xf32>
      %25 = vector.multi_reduction <add>, %24, %cst_14 [1, 2] : vector<1x2x128xf32> to vector<1xf32>
      %26 = vector.shape_cast %25 : vector<1xf32> to vector<1x1x1xf32>
      %27 = vector.extract %26[0, 0, 0] : f32 from vector<1x1x1xf32>
      %28 = vector.broadcast %27 : f32 to vector<1x1xf32>
      %c0_15 = arith.constant 0 : index
      %c0_16 = arith.constant 0 : index
      %29 = vector.load %arg5[%c0_15, %c0_16] : memref<1x1xf32, #tpu.memory_space<vmem>>, vector<1x1xf32>
      tpu.vector_store %arg5[%c0_15, %c0_16], %28 {strides = array<i32>} : memref<1x1xf32, #tpu.memory_space<vmem>>, vector<1x1xf32>,
    } else {
    }
    return
  }
  func.func @transform_0(%arg0: i32, %arg1: i32) -> (i32, i32) {
    %c2_i32 = arith.constant 2 : i32
    %0 = arith.muli %arg0, %c2_i32 : i32
    %1 = arith.addi %0, %arg1 : i32
    %c0_i32 = arith.constant 0 : i32
    %c0_i32_0 = arith.constant 0 : i32
    return %c0_i32, %1 : i32, i32
  }
  func.func @transform_1(%arg0: i32, %arg1: i32) -> (i32, i32) {
    %c2_i32 = arith.constant 2 : i32
    %0 = arith.muli %arg0, %c2_i32 : i32
    %1 = arith.addi %0, %arg1 : i32
    %c0_i32 = arith.constant 0 : i32
    %c0_i32_0 = arith.constant 0 : i32
    return %c0_i32, %1 : i32, i32
  }
  func.func @transform_2(%arg0: i32, %arg1: i32) -> (i32, i32) {
    %c2_i32 = arith.constant 2 : i32
    %0 = arith.muli %arg0, %c2_i32 : i32
    %1 = arith.addi %0, %arg1 : i32
    %c0_i32 = arith.constant 0 : i32
    %c0_i32_0 = arith.constant 0 : i32
    return %c0_i32, %1 : i32, i32
  }
  func.func @transform_3(%arg0: i32, %arg1: i32) -> (i32, i32) {
    %c0_i32 = arith.constant 0 : i32
    %c0_i32_0 = arith.constant 0 : i32
    return %arg0, %c0_i32 : i32, i32
  }
}

</mosaic_0001>

<bundles_post_ra>
// kernel: tpu_custom_call.1
= control target key start
LH: loop header
LB: loop body
LE: loop exit
PB: predicated region body
PF: predicated region fallthrough
CT: control target
= control target key end

     0   :  { %8 = vsyncpa [#allocation4], 0  ;;  %s887_s0 = inlined_call_operand.hbm [shape: f32[2,256], index: 0, kind: input, shape index: {}]   ;;  %s888_s1 = inlined_call_operand.hbm [shape: f32[2,256], index: 1, kind: input, shape index: {}]   ;;  %s889_s2 = inlined_call_operand.hbm [shape: f32[2,256], index: 2, kind: input, shape index: {}]   ;;  %s890_s3 = inlined_call_operand.hbm [shape: f32[1,1], index: 3, kind: output, shape index: {}]  }
   0x1   :  { %10 = vsyncpa [#allocation4 + $0x1], 0 }
   0x2   :  { %11 = vsyncpa [#allocation7], 0 }
   0x3   :  { %13 = vsyncpa [#allocation7 + $0x1], 0 }
   0x4   :  { %14 = vsyncpa [#allocation5], 0  ;;  %s734_s12 = smov 0   ;;  %s736_s13 = smov 0  }
   0x5   :  { %s738_s14 = smov 0   ;;  %s740_s15 = smov 0  }
   0x6   :  { %s742_s16 = smov 0   ;;  %s744_s17 = smov 0  }
   0x7 LB: > { %s763_s18 = sadd.s32 4294967295, %s707_s17   ;;  %s29_s19 = sadd.s32 1, %s703_s16  ;;  %s707_s17 = sphi %s744_s17, %s20_s17   ;;  %s703_s16 = sphi %s742_s16, %s898_s16   ;;  %s699_s15 = sphi %s740_s15, %s897_s15   ;;  %s695_s14 = sphi %s738_s14, %s896_s14   ;;  %s691_s13 = sphi %s736_s13, %s895_s13   ;;  %s687_s12 = sphi %s734_s12, %s894_s12  }
   0x8   : > { %p30_p0 = scmp.ge.s32.totalorder %s29_s19, 2  ;;  %s43_s20 = sadd.s32 1, %s695_s14 }
   0x9   : > { %p50_p1 = scmp.ne.s32.totalorder %s695_s14, %s691_s13  ;;  %p51_p2 = scmp.eq.s32.totalorder %s707_s17, 0 }
   0xa   : > { %s900_s19 = smov (%p30_p0, %s29_s19), 0  ;;  %p56_p4 = scmp.ne.s32.totalorder %s691_s13, %s687_s12 }
   0xb   : > { %p52_p3 = por %p51_p2, %p50_p1  ;;  %s40_s21 = ssub.s32 %s703_s16, %s900_s19 }
   0xc   : > { %p57_p5 = scmp.eq.s32.totalorder %s763_s18, 0  ;;  %p41_p6 = scmp.eq.s32.totalorder %s40_s21, 0 }
   0xd   : > { %p486_p8 = scmp.lt.s32.totalorder %s707_s17, 2  ;;  %s166_s24 = sand.u32 1, %s695_s14  }
   0xe   : > { %p776_p7 = por %p57_p5, %p56_p4  ;;  %s786_s25 = sshll.u32 %s703_s16, 5 }
   0xf   : > { %s782_s23 = scalar_select %p41_p6, %s695_s14, %s43_s20  }
  0x10   : > { %s790_s26 = sshll.u32 %s166_s24, 1  ;;  %p792_p9 = pnand %p486_p8, %p52_p3 }
  0x11   : > { %s186_s28 = sand.u32 1, %s707_s17   ;;  %s197_s4 = scalar_lea.hbm %s888_s1, %s786_s25 }
  0x12   : > { %s190_s5 = scalar_lea.vmem [#allocation6], %s790_s26  ;;  %p454_p10 = scmp.ge.s32.totalorder %s707_s17, 1 }
  0x13   : > { %s199_s6 = sshll.u32 %s190_s5, 4  ;;  %s803_s7 = scalar_lea.sflag [#allocation7], %s186_s28  ;;  %s200_s6 = int_to_ptr.vmem [resolvable:$true] %s199_s6 }
  0x14   : > { %p543_p11 = pneg %p792_p9  ;;  %s554_s8 = scalar_lea.vmem %s200_s6, 32 }
  0x15   : > { %p555_p12 = scmp.ne.s32.totalorder %s200_s6, %s554_s8  ;;  %s709_s9 = smov [#allocation6]  }
  0x16   : > { %s559_s10 = sshll.u32 %s709_s9, 4  ;;  %s560_s10 = int_to_ptr.vmem [resolvable:$false] %s559_s10 }
  0x17   : > { %p557_p13 = pnand %p555_p12, %p543_p11  ;;  %s561_s11 = scalar_lea.vmem %s560_s10, 64 }
  0x18   : > { %p562_p1 = scmp.lt.s32.totalorder %s200_s6, %s560_s10  ;;  %p563_p2 = scmp.lt.s32.totalorder %s561_s11, %s554_s8 }
  0x19   : > { %p558_p0 = pneg %p557_p13 }
  0x1a   : > { %p564_p3 = por %p563_p2, %p562_p1 }
  0x1c   : > { %p565_p4 = pnand %p564_p3, %p558_p0 }
  0x1e   : > { %568 = shalt.err (!%p565_p4)
}
  0x1f   : > { %482 = dma.hbm_to_vmem [thread:$0]  (!%p792_p9), %s197_s4, 32, %s200_s6, %s803_s7  }
  0x20   : > { %p224_p5 = scmp.lt.s32.totalorder %s707_s17, 3  ;;  %s177_s28 = scalar_lea.hbm %s887_s0, %s786_s25 }
  0x21   : > { %s170_s29 = scalar_lea.vmem [#allocation3], %s790_s26  ;;  %s167_s5 = scalar_lea.sflag [#allocation4], %s166_s24 }
  0x22   : > { %p816_p6 = pnand %p454_p10, %p224_p5  ;;  %s179_s30 = sshll.u32 %s170_s29, 4  ;;  %s180_s30 = int_to_ptr.vmem [resolvable:$true] %s179_s30 }
  0x23   : > { %s582_s8 = scalar_lea.vmem %s180_s30, 32  ;;  %s710_s4 = smov [#allocation3]  }
  0x24   : > { %p583_p8 = scmp.ne.s32.totalorder %s180_s30, %s582_s8  ;;  %s587_s6 = sshll.u32 %s710_s4, 4  ;;  %s588_s6 = int_to_ptr.vmem [resolvable:$false] %s587_s6 }
  0x25   : > { %s589_s9 = scalar_lea.vmem %s588_s6, 64  ;;  %p590_p10 = scmp.lt.s32.totalorder %s180_s30, %s588_s6 }
  0x26   : > { %p585_p12 = pnand %p583_p8, %p543_p11  ;;  %p591_p0 = scmp.lt.s32.totalorder %s589_s9, %s582_s8 }
  0x28   : > { %p586_p13 = pneg %p585_p12  ;;  %p592_p1 = por %p591_p0, %p590_p10 }
  0x2a   : > { %p593_p2 = pnand %p592_p1, %p586_p13 }
  0x2c   : > { %596 = shalt.err (!%p593_p2)
}
  0x2d   : > { %479 = dma.hbm_to_vmem [thread:$0]  (!%p792_p9), %s177_s28, 32, %s180_s30, %s167_s5  }
  0x2e   : > { %s217_s11 = scalar_lea.hbm %s889_s2, %s786_s25  ;;  %s210_s20 = scalar_lea.vmem [#allocation8], %s790_s26 }
  0x2f   : > { %s219_s21 = sshll.u32 %s210_s20, 4  ;;  %s711_s8 = smov [#allocation8]   ;;  %s220_s21 = int_to_ptr.vmem [resolvable:$true] %s219_s21 }
  0x30   : > { %s610_s29 = scalar_lea.vmem %s220_s21, 32  ;;  %s615_s4 = sshll.u32 %s711_s8, 4  ;;  %s616_s4 = int_to_ptr.vmem [resolvable:$false] %s615_s4 }
  0x31   : > { %p611_p3 = scmp.ne.s32.totalorder %s220_s21, %s610_s29  ;;  %s617_s6 = scalar_lea.vmem %s616_s4, 64 }
  0x32   : > { %p618_p8 = scmp.lt.s32.totalorder %s220_s21, %s616_s4  ;;  %p619_p12 = scmp.lt.s32.totalorder %s617_s6, %s610_s29 }
  0x33   : > { %p613_p4 = pnand %p611_p3, %p543_p11 }
  0x34   : > { %p620_p13 = por %p619_p12, %p618_p8 }
  0x35   : > { %p614_p5 = pneg %p613_p4 }
  0x37   : > { %p621_p10 = pnand %p620_p13, %p614_p5 }
  0x39   : > { %624 = shalt.err (!%p621_p10)
}
  0x3a   : > { %485 = dma.hbm_to_vmem [thread:$0]  (!%p792_p9), %s217_s11, 32, %s220_s21, %s803_s7  }
  0x3b   : > { %228 = sbr.rel (%p816_p6) target bundleno = 329 (0x149), region = 32  ;;  %s230_s25 = sand.u32 (!%p816_p6), 1, %s691_s13  }
  0x3c   : > { %s455_s26 = sshll.u32 (!%p816_p6), %s230_s25, 1  ;;  %s231_s28 = scalar_lea.sflag (!%p816_p6), [#allocation4], %s230_s25 }
  0x3d   : > { %s234_s30 = scalar_lea.vmem (!%p816_p6), [#allocation3], %s455_s26 }
  0x40   : > { %674 = dma.done.wait (%p776_p7), %s231_s28, 32  }
  0x41   : > { %676 = vsyncadd (%p776_p7), %s231_s28, 4294967264  ;;  %s239_s5 = sand.u32 1, %s763_s18   ;;  %s243_s9 = scalar_lea.vmem [#allocation6], %s455_s26 }
  0x42   : > { %s240_s27 = scalar_lea.sflag [#allocation7], %s239_s5 }
  0x43   : > { %678 = dma.done.wait (%p776_p7), %s240_s27, 64  }
  0x44   : > { %680 = vsyncadd (%p776_p7), %s240_s27, 4294967232  ;;  %s252_s7 = scalar_lea.vmem [#allocation8], %s455_s26  ;;  %p458_p9 = scmp.ne.s32.totalorder %s699_s15, 0 }
  0x46   : > { %289 = sbr.rel (%p458_p9) target bundleno = 77 (0x4d), region = 48 }
  0x4b   : > { %v712_v0 = vmov 0.0  }
  0x4c   : > { %290 = vst [vmem:[#allocation2] sm:$0x3] %v712_v0 }
  0x4d PF: > { %v291_v1 = vld [vmem:[%s234_s30] sm:$0x3]  ;;  %v292_v2 = vld [vmem:[%s243_s9] sm:$0x3]  ;;  %v293_v9 = vld [vmem:[%s252_s7] sm:$0x3] }
  0x4e   : > { %v296_v3 = vand.u32 2147483647, %v291_v1  ;;  %v297_v4 = vand.u32 2147483647, %v292_v2  ;;  %v294_v6 = vsub.f32 %v291_v1, %v292_v2  ;;  %p459_p7 = scmp.ne.s32.totalorder %s699_s15, 1 }
  0x50   : > { %v298_v5 = vadd.f32 %v297_v4, %v296_v3  ;;  %v295_v7 = vand.u32 2147483647, %v294_v6 }
  0x52   : > { %539 = vrcp.f32 %v298_v5  ;;  %vm299_vm0 = vcmp.eq.f32.partialorder %v298_v5, 0.0 }
  0x53   : > { %v304_v12 = vld [vmem:[#allocation2] sm:$0x3] }
  0x5f   : > { %v540_v8 = vpop.eup %539 }
  0x60   : > { %v301_v10 = vmul.f32 %v540_v8, %v295_v7 }
  0x62   : > { %v302_v11 = vsel %vm299_vm0, 0.0, %v301_v10 }
  0x63   : > { %v303_v13 = vmul.f32 %v302_v11, %v293_v9  ;;  %310 = sbr.rel (%p459_p7) target bundleno = 314 (0x13a), region = 52 }
  0x65   : > { %v305_v14 = vadd.f32 %v304_v12, %v303_v13 }
  0x67   : > { %306 = vst [vmem:[#allocation2] sm:$0x3] %v305_v14 }
  0x68   : > { %vm312_vm1 = vcmask 1041408   ;;  %vm324_vm2 = vcmask 0  }
  0x6e   : > { %v311_v15 = vld [vmem:[#allocation2] sm:$0x3] }
  0x6f   : > { %v313_v16 = vsel %vm312_vm1, %v311_v15, 0.0 }
  0x70   : > { %314 = vadd.xlane.f32.xlu0 %v313_v16 }
  0xf9   : > { %v315_v17 = vpop.xlane.xlu0 %314 }
  0xfa   : > { %v316_v18 = vrot.slane %v315_v17, 4 }
  0xfc   : > { %v317_v19 = vadd.f32 %v316_v18, %v315_v17 }
  0xfe   : > { %v318_v20 = vrot.slane %v317_v19, 2 }
 0x100   : > { %v319_v21 = vadd.f32 %v318_v20, %v317_v19 }
 0x102   : > { %v320_v22 = vrot.slane %v319_v21, 1 }
 0x104   : > { %v321_v23 = vadd.f32 %v320_v22, %v319_v21 }
 0x106   : > { %464 = vpush %v321_v23 }
 0x137   : > { %s465_s22 = spop %464 }
 0x138   : > { %v323_v24 = vstv %s465_s22 }
 0x139   : > { %325 = vst.msk [vmem:[#allocation9] sm:$0x1] %vm324_vm2, %v323_v24 }
 0x13a PF: > { %p487_p11 = scmp.eq.s32.totalorder %s763_s18, 1  ;;  %s713_s15 = smov [#allocation9]  }
 0x13b   : > { %s335_s12 = sshll.u32 %s713_s15, 4  ;;  %s336_s12 = int_to_ptr.vmem [resolvable:$true] %s335_s12 }
 0x13c   : > { %s625_s24 = scalar_lea.vmem %s336_s12, 16  ;;  %s631_s10 = scalar_lea.vmem %s336_s12, 32 }
 0x13d   : > { %p626_p6 = scmp.ne.s32.totalorder %s336_s12, %s625_s24  ;;  %p632_p2 = scmp.lt.s32.totalorder %s336_s12, %s336_s12 }
 0x13e   : > { %p633_p3 = scmp.lt.s32.totalorder %s631_s10, %s625_s24 }
 0x13f   : > { %p627_p0 = pnand %p626_p6, %p487_p11 }
 0x140   : > { %p634_p4 = por %p633_p3, %p632_p2 }
 0x141   : > { %p628_p1 = pneg %p627_p0 }
 0x143   : > { %p635_p5 = pnand %p634_p4, %p628_p1 }
 0x145   : > { %638 = shalt.err (!%p635_p5)
}
 0x146   : > { %473 = dma.vmem_to_hbm [thread:$0]  (%p487_p11), %s336_s12, 16, %s890_s3, [#allocation5]  }
 0x147   : > { %682 = dma.done.wait (%p487_p11), [#allocation5], 16  }
 0x148   : > { %684 = vsyncadd (%p487_p11), [#allocation5], 4294967280 }
 0x149 PF: > { %s20_s17 = sadd.s32 1, %s707_s17   ;;  %s894_s12 = smov %s691_s13 }
 0x14a   : > { %p17_p8 = scmp.ge.s32.totalorder %s20_s17, 4   ;;  %s895_s13 = smov %s695_s14 }
 0x14b   : > { %s896_s14 = smov %s782_s23  ;;  %s897_s15 = smov %s703_s16 }
 0x14c   : > { %s898_s16 = smov %s900_s19  ;;  %19 = sbr.rel (!%p17_p8) target bundleno = 7 (0x7), region = 102 }
 0x151   :  { %348 = vsyncpa [#allocation4], 1 }
 0x152   :  { %350 = vsyncpa [#allocation4 + $0x1], 1 }
 0x153   :  { %351 = vsyncpa [#allocation7], 1 }
 0x154   :  { %353 = vsyncpa [#allocation7 + $0x1], 1 }
 0x155   :  { %354 = vsyncpa [#allocation5], 1 }
 0x156   :  { %356 = vsyncpa [#allocation5 + $0x1], 1 }

</bundles_post_ra>
